<compile_context>
chip_gen: v7x
topology: tpu7x:2x2x1
jax: 0.10.0
libtpu: 0.0.40
codegen_flags: <defaults>
</compile_context>

<pallas_src>
import jax
import jax.numpy as jnp
from jax.experimental import pallas as pl
from jax.experimental.pallas import tpu as pltpu


def _round_up(x, m):
    return ((x + m - 1) // m) * m


def totem_kernel(x_ref,        # (T, BB, D)  bf16, time-major batch block
                 wih_f_ref,    # (D, 4H)     bf16, fwd input weights, gates [i,f,o,g]
                 b_f_ref,      # (1, 4H)     f32,  fwd b_ih + b_hh, gates [i,f,o,g]
                 whh_f_ref,    # (H, 4H)     bf16, fwd recurrent weights
                 wih_b_ref,    # (D, 4H)     bf16, bwd input weights
                 b_b_ref,      # (1, 4H)     f32,  bwd bias
                 fcwf_ref,     # (H, O_pad)  bf16, fc rows for forward features
                 fcwb_ref,     # (H, O_pad)  bf16, fc rows for backward features
                 fcb_ref,      # (1, O_pad)  f32
                 out_ref,      # (BB, O_pad) f32
                 xp_ref):      # (T, BB, 4H) f32  VMEM scratch (staged projection)
    T, BB, D = x_ref.shape
    H = whh_f_ref.shape[0]
    G = 4 * H
    H3 = 3 * H

    # ---- (1) Forward-direction input projection for ALL timesteps in one MXU
    #      matmul (bias folded), staged into a time-major VMEM scratch so each
    #      recurrence step does one contiguous (BB, G) load.
    x2 = x_ref[...].reshape(T * BB, D)                        # tile-aligned (BB % 8 == 0)
    xp = jnp.dot(x2, wih_f_ref[...],
                 preferred_element_type=jnp.float32) + b_f_ref[...]
    xp_ref[...] = xp.reshape(T, BB, G)

    whh = whh_f_ref[...]                                      # resident across recurrence
    h = jnp.zeros((BB, H), jnp.float32)
    c = jnp.zeros((BB, H), jnp.float32)

    # ---- (2) Forward recurrence, statically unrolled (T is small & static).
    #      Gate order [i, f, o, g]: one sigmoid over 3H lanes + one tanh per
    #      step on the serial critical path.
    for t in range(T):
        g = xp_ref[t] + jnp.dot(h.astype(jnp.bfloat16), whh,
                                preferred_element_type=jnp.float32)
        sg = jax.nn.sigmoid(g[:, :H3])
        i_g = sg[:, 0 * H:1 * H]
        f_g = sg[:, 1 * H:2 * H]
        o_g = sg[:, 2 * H:H3]
        g_g = jnp.tanh(g[:, H3:])
        c = f_g * c + i_g * g_g
        h = o_g * jnp.tanh(c)
    h_fwd = h

    # ---- (3) Backward direction at position T-1 is a single cell step from a
    #      zero state: h0 @ W_hh_bwd == 0 and f*c0 == 0, so only one tiny
    #      (BB, D) x (D, 4H) matmul on x[T-1] is needed.
    gb = jnp.dot(x_ref[T - 1], wih_b_ref[...],
                 preferred_element_type=jnp.float32) + b_b_ref[...]
    sb = jax.nn.sigmoid(gb[:, :H3])
    ib = sb[:, 0 * H:1 * H]
    ob = sb[:, 2 * H:H3]
    gbb = jnp.tanh(gb[:, H3:])
    h_bwd = ob * jnp.tanh(ib * gbb)

    # ---- (4) FC head split across the two feature halves (no concat); output
    #      block is lane-dense (O padded to 128) so the final store is unmasked.
    out_ref[...] = (
        jnp.dot(h_fwd.astype(jnp.bfloat16), fcwf_ref[...],
                preferred_element_type=jnp.float32)
        + jnp.dot(h_bwd.astype(jnp.bfloat16), fcwb_ref[...],
                  preferred_element_type=jnp.float32)
        + fcb_ref[...])


def _reorder_ifgo_to_ifog(w):
    """Permute gate columns from PyTorch order [i, f, g, o] to [i, f, o, g]."""
    H = w.shape[1] // 4
    return jnp.concatenate([w[:, :2 * H], w[:, 3 * H:], w[:, 2 * H:3 * H]], axis=1)


def pack_params(params):
    """Re-layout the (PyTorch-mirroring) parameters for the kernel:
       - permute gate columns to [i, f, o, g] (single fused sigmoid in-kernel),
       - cast MXU operands to bf16 (f32 accumulate inside the kernel),
       - pad the FC output dim to a multiple of 128 lanes and split its rows,
       - drop W_hh_bwd: mathematically unused for the last-timestep output
         (zero initial state for the reverse scan)."""
    H = params["whh_f"].shape[0]
    O = params["fcw"].shape[1]
    O_pad = _round_up(max(O, 1), 128)

    fcw_pad = jnp.pad(params["fcw"], ((0, 0), (0, O_pad - O)))
    return {
        "wih_f": _reorder_ifgo_to_ifog(params["wih_f"]).astype(jnp.bfloat16),  # (D, 4H)
        "b_f":   _reorder_ifgo_to_ifog(params["b_f"]).astype(jnp.float32),     # (1, 4H)
        "whh_f": _reorder_ifgo_to_ifog(params["whh_f"]).astype(jnp.bfloat16),  # (H, 4H)
        "wih_b": _reorder_ifgo_to_ifog(params["wih_b"]).astype(jnp.bfloat16),  # (D, 4H)
        "b_b":   _reorder_ifgo_to_ifog(params["b_b"]).astype(jnp.float32),     # (1, 4H)
        "fcw_f": fcw_pad[:H].astype(jnp.bfloat16),                             # (H, O_pad)
        "fcw_b": fcw_pad[H:].astype(jnp.bfloat16),                             # (H, O_pad)
        "fcb":   jnp.pad(params["fcb"],
                         ((0, 0), (0, O_pad - O))).astype(jnp.float32),        # (1, O_pad)
    }


def totem_forward(x_btd, packed, output_dim):
    """x_btd: (B, T, D) float32 in the PyTorch batch-first layout."""
    B, T, D = x_btd.shape
    H = packed["whh_f"].shape[0]
    G = 4 * H
    O_pad = packed["fcb"].shape[1]

    # Batch tiling: sublane-aligned tiles.  For 128 <= B < 256 use 64-row tiles
    # so the "parallel" grid axis has >= 2 programs (v7x megacore); 128-row
    # tiles once the batch is large enough.
    if B >= 256:
        BB = 128
    elif B >= 128:
        BB = 64
    else:
        BB = _round_up(B, 8)
    B_pad = _round_up(B, BB)
    if B_pad != B:
        x_btd = jnp.pad(x_btd, ((0, B_pad - B), (0, 0), (0, 0)))

    # Time-major + bf16: one cheap XLA transpose/cast in HBM.  Halves the x DMA
    # and makes the in-kernel (T, BB, D) -> (T*BB, D) reshape tile-aligned for
    # any T (only BB % 8 == 0 is required).
    x_tbd = jnp.transpose(x_btd, (1, 0, 2)).astype(jnp.bfloat16)

    full2 = lambda shape: pl.BlockSpec(shape, lambda i: (0, 0))

    out = pl.pallas_call(
        totem_kernel,
        out_shape=jax.ShapeDtypeStruct((B_pad, O_pad), jnp.float32),
        grid=(B_pad // BB,),
        in_specs=[
            pl.BlockSpec((T, BB, D), lambda i: (0, i, 0)),   # time-major batch tile
            full2((D, G)),                                   # fwd W_ih
            full2((1, G)),                                   # fwd bias
            full2((H, G)),                                   # fwd W_hh
            full2((D, G)),                                   # bwd W_ih
            full2((1, G)),                                   # bwd bias
            full2((H, O_pad)),                               # fc rows (fwd)
            full2((H, O_pad)),                               # fc rows (bwd)
            full2((1, O_pad)),                               # fc bias (padded)
        ],
        out_specs=pl.BlockSpec((BB, O_pad), lambda i: (i, 0)),
        scratch_shapes=[pltpu.VMEM((T, BB, G), jnp.float32)],  # staged projection
        compiler_params=pltpu.CompilerParams(
            dimension_semantics=("parallel",),
            vmem_limit_bytes=32 * 1024 * 1024,
        ),
    )(x_tbd,
      packed["wih_f"], packed["b_f"], packed["whh_f"],
      packed["wih_b"], packed["b_b"],
      packed["fcw_f"], packed["fcw_b"], packed["fcb"])

    return out[:B, :output_dim]


def init_params(key, input_dim, hidden_dim, output_dim):
    """Deterministic init mirroring PyTorch's U(-1/sqrt(H), 1/sqrt(H)) shapes.
    Weights stored pre-transposed as (in_features, out_features); LSTM biases
    stored as the sum b_ih + b_hh (shape (1, 4H)). Gate order: i, f, g, o."""
    H, D, O = hidden_dim, input_dim, output_dim
    k = 1.0 / jnp.sqrt(H)
    keys = jax.random.split(key, 9)
    u = lambda kk, shape, bound: jax.random.uniform(kk, shape, jnp.float32, -bound, bound)
    return {
        "wih_f": u(keys[0], (D, 4 * H), k),
        "whh_f": u(keys[1], (H, 4 * H), k),
        "b_f":   u(keys[2], (1, 4 * H), k) + u(keys[3], (1, 4 * H), k),
        "wih_b": u(keys[4], (D, 4 * H), k),
        "whh_b": u(keys[5], (H, 4 * H), k),   # unused by the kernel (see pack_params)
        "b_b":   u(keys[6], (1, 4 * H), k) + u(keys[7], (1, 4 * H), k),
        "fcw":   u(keys[8], (2 * H, O), 1.0 / jnp.sqrt(2 * H)),
        "fcb":   jnp.zeros((1, O), jnp.float32),
    }


def totem_reference(x_btd, params):
    """Pure-JAX f32 reference (full bidirectional LSTM, then slice last timestep)."""
    B, T, D = x_btd.shape
    H = params["whh_f"].shape[0]

    def cell(x_t, h, c, wih, whh, b):
        g = x_t @ wih + h @ whh + b
        i = jax.nn.sigmoid(g[:, :H]); f = jax.nn.sigmoid(g[:, H:2 * H])
        gg = jnp.tanh(g[:, 2 * H:3 * H]); o = jax.nn.sigmoid(g[:, 3 * H:])
        c2 = f * c + i * gg
        return o * jnp.tanh(c2), c2

    h = c = jnp.zeros((B, H), jnp.float32)
    for t in range(T):
        h, c = cell(x_btd[:, t], h, c, params["wih_f"], params["whh_f"], params["b_f"])
    h_fwd = h
    h = c = jnp.zeros((B, H), jnp.float32)
    h_bwd_at = [None] * T
    for t in range(T - 1, -1, -1):
        h, c = cell(x_btd[:, t], h, c, params["wih_b"], params["whh_b"], params["b_b"])
        h_bwd_at[t] = h
    feat = jnp.concatenate([h_fwd, h_bwd_at[T - 1]], axis=-1)
    return feat @ params["fcw"] + params["fcb"]


if __name__ == "__main__":
    B, T, D, H, O = 4, 8, 16, 32, 8

    key = jax.random.PRNGKey(0)
    kx, kp = jax.random.split(key)
    x = jax.random.normal(kx, (B, T, D), dtype=jnp.float32)
    params = init_params(kp, D, H, O)
    packed = pack_params(params)

    out = totem_forward(x, packed, O)
    out = jax.block_until_ready(out)

    ref = totem_reference(x, params)
    assert out.shape == (B, O)
    # Kernel feeds bf16 operands to the MXU (f32 accumulate) and ships x as
    # bf16; compare against the pure-f32 reference with a relaxed tolerance.
    assert jnp.allclose(out, ref, atol=2e-2, rtol=1e-2), "mismatch vs pure-JAX reference"

    print("KERNEL_OK")
</pallas_src>

<mosaic_0001>
module attributes {stable_mosaic.version = 11 : i64} {
  func.func @totem_kernel(%arg0: i32, %arg1: memref<8x8x16xbf16, #tpu.memory_space<vmem>>, %arg2: memref<16x128xbf16, #tpu.memory_space<vmem>>, %arg3: memref<1x128xf32, #tpu.memory_space<vmem>>, %arg4: memref<32x128xbf16, #tpu.memory_space<vmem>>, %arg5: memref<16x128xbf16, #tpu.memory_space<vmem>>, %arg6: memref<1x128xf32, #tpu.memory_space<vmem>>, %arg7: memref<32x128xbf16, #tpu.memory_space<vmem>>, %arg8: memref<32x128xbf16, #tpu.memory_space<vmem>>, %arg9: memref<1x128xf32, #tpu.memory_space<vmem>>, %arg10: memref<8x128xf32, #tpu.memory_space<vmem>>, %arg11: memref<8x8x128xf32, #tpu.memory_space<vmem>>) attributes {dimension_semantics = [#tpu.dimension_semantics<parallel>], iteration_bounds = array<i64: 1>, scalar_prefetch = 0 : i64, scratch_operands = 1 : i64, tpu.core_type = #tpu.core_type<tc>, window_params = [{transform_indices = @transform_0, window_bounds = array<i64: 8, 8, 16>}, {pipeline_mode = #tpu.pipeline_mode<synchronous>, transform_indices = @transform_1, window_bounds = array<i64: 16, 128>}, {pipeline_mode = #tpu.pipeline_mode<synchronous>, transform_indices = @transform_2, window_bounds = array<i64: 1, 128>}, {pipeline_mode = #tpu.pipeline_mode<synchronous>, transform_indices = @transform_3, window_bounds = array<i64: 32, 128>}, {pipeline_mode = #tpu.pipeline_mode<synchronous>, transform_indices = @transform_4, window_bounds = array<i64: 16, 128>}, {pipeline_mode = #tpu.pipeline_mode<synchronous>, transform_indices = @transform_5, window_bounds = array<i64: 1, 128>}, {pipeline_mode = #tpu.pipeline_mode<synchronous>, transform_indices = @transform_6, window_bounds = array<i64: 32, 128>}, {pipeline_mode = #tpu.pipeline_mode<synchronous>, transform_indices = @transform_7, window_bounds = array<i64: 32, 128>}, {pipeline_mode = #tpu.pipeline_mode<synchronous>, transform_indices = @transform_8, window_bounds = array<i64: 1, 128>}, {transform_indices = @transform_9, window_bounds = array<i64: 8, 128>}]} {
    %c0 = arith.constant 0 : index
    %c0_0 = arith.constant 0 : index
    %c0_1 = arith.constant 0 : index
    %0 = vector.load %arg1[%c0, %c0_0, %c0_1] : memref<8x8x16xbf16, #tpu.memory_space<vmem>>, vector<8x8x16xbf16>
    %1 = vector.shape_cast %0 : vector<8x8x16xbf16> to vector<64x16xbf16>
    %c0_2 = arith.constant 0 : index
    %c0_3 = arith.constant 0 : index
    %2 = vector.load %arg2[%c0_2, %c0_3] : memref<16x128xbf16, #tpu.memory_space<vmem>>, vector<16x128xbf16>
    %cst = arith.constant dense<0.000000e+00> : vector<64x128xf32>
    %3 = tpu.matmul %1, %2, %cst {dimension_numbers = #tpu.dot_dimension_numbers<[1], [0], [0], [1], [0, 0, 1, 1], [], []>} : vector<64x16xbf16>, vector<16x128xbf16>, vector<64x128xf32> -> vector<64x128xf32>
    %c0_4 = arith.constant 0 : index
    %c0_5 = arith.constant 0 : index
    %4 = vector.load %arg3[%c0_4, %c0_5] : memref<1x128xf32, #tpu.memory_space<vmem>>, vector<1x128xf32>
    %5 = vector.broadcast %4 : vector<1x128xf32> to vector<64x128xf32>
    %6 = arith.addf %3, %5 : vector<64x128xf32>
    %7 = vector.shape_cast %6 : vector<64x128xf32> to vector<8x8x128xf32>
    %c0_6 = arith.constant 0 : index
    %c0_7 = arith.constant 0 : index
    %c0_8 = arith.constant 0 : index
    %8 = vector.load %arg11[%c0_6, %c0_7, %c0_8] : memref<8x8x128xf32, #tpu.memory_space<vmem>>, vector<8x8x128xf32>
    tpu.vector_store %arg11[%c0_6, %c0_7, %c0_8], %7 {strides = array<i32>} : memref<8x8x128xf32, #tpu.memory_space<vmem>>, vector<8x8x128xf32>,
    %c0_9 = arith.constant 0 : index
    %c0_10 = arith.constant 0 : index
    %9 = vector.load %arg4[%c0_9, %c0_10] : memref<32x128xbf16, #tpu.memory_space<vmem>>, vector<32x128xbf16>
    %cst_11 = arith.constant 0.000000e+00 : f32
    %10 = vector.broadcast %cst_11 : f32 to vector<8x32xf32>
    %cst_12 = arith.constant 0.000000e+00 : f32
    %11 = vector.broadcast %cst_12 : f32 to vector<8x32xf32>
    %c0_13 = arith.constant 0 : index
    %c0_14 = arith.constant 0 : index
    %c0_15 = arith.constant 0 : index
    %12 = vector.load %arg11[%c0_13, %c0_14, %c0_15] : memref<8x8x128xf32, #tpu.memory_space<vmem>>, vector<1x8x128xf32>
    %13 = vector.shape_cast %12 : vector<1x8x128xf32> to vector<8x128xf32>
    %14 = arith.truncf %10 : vector<8x32xf32> to vector<8x32xbf16>
    %cst_16 = arith.constant dense<0.000000e+00> : vector<8x128xf32>
    %15 = tpu.matmul %14, %9, %cst_16 {dimension_numbers = #tpu.dot_dimension_numbers<[1], [0], [0], [1], [0, 0, 1, 1], [], []>} : vector<8x32xbf16>, vector<32x128xbf16>, vector<8x128xf32> -> vector<8x128xf32>
    %16 = arith.addf %13, %15 : vector<8x128xf32>
    %17 = vector.extract_strided_slice %16 {offsets = [0, 0], sizes = [8, 96], strides = [1, 1]} : vector<8x128xf32> to vector<8x96xf32>
    %18 = arith.negf %17 : vector<8x96xf32>
    %19 = math.exp %18 : vector<8x96xf32>
    %cst_17 = arith.constant 1.000000e+00 : f32
    %20 = vector.broadcast %cst_17 : f32 to vector<8x96xf32>
    %21 = arith.addf %20, %19 : vector<8x96xf32>
    %22 = arith.divf %20, %21 : vector<8x96xf32>
    %23 = vector.extract_strided_slice %22 {offsets = [0, 0], sizes = [8, 32], strides = [1, 1]} : vector<8x96xf32> to vector<8x32xf32>
    %24 = vector.extract_strided_slice %22 {offsets = [0, 32], sizes = [8, 32], strides = [1, 1]} : vector<8x96xf32> to vector<8x32xf32>
    %25 = vector.extract_strided_slice %22 {offsets = [0, 64], sizes = [8, 32], strides = [1, 1]} : vector<8x96xf32> to vector<8x32xf32>
    %26 = vector.extract_strided_slice %16 {offsets = [0, 96], sizes = [8, 32], strides = [1, 1]} : vector<8x128xf32> to vector<8x32xf32>
    %27 = math.tanh %26 : vector<8x32xf32>
    %28 = arith.mulf %24, %11 : vector<8x32xf32>
    %29 = arith.mulf %23, %27 : vector<8x32xf32>
    %30 = arith.addf %28, %29 : vector<8x32xf32>
    %31 = math.tanh %30 : vector<8x32xf32>
    %32 = arith.mulf %25, %31 : vector<8x32xf32>
    %c1 = arith.constant 1 : index
    %c0_18 = arith.constant 0 : index
    %c0_19 = arith.constant 0 : index
    %33 = vector.load %arg11[%c1, %c0_18, %c0_19] : memref<8x8x128xf32, #tpu.memory_space<vmem>>, vector<1x8x128xf32>
    %34 = vector.shape_cast %33 : vector<1x8x128xf32> to vector<8x128xf32>
    %35 = arith.truncf %32 : vector<8x32xf32> to vector<8x32xbf16>
    %cst_20 = arith.constant dense<0.000000e+00> : vector<8x128xf32>
    %36 = tpu.matmul %35, %9, %cst_20 {dimension_numbers = #tpu.dot_dimension_numbers<[1], [0], [0], [1], [0, 0, 1, 1], [], []>} : vector<8x32xbf16>, vector<32x128xbf16>, vector<8x128xf32> -> vector<8x128xf32>
    %37 = arith.addf %34, %36 : vector<8x128xf32>
    %38 = vector.extract_strided_slice %37 {offsets = [0, 0], sizes = [8, 96], strides = [1, 1]} : vector<8x128xf32> to vector<8x96xf32>
    %39 = arith.negf %38 : vector<8x96xf32>
    %40 = math.exp %39 : vector<8x96xf32>
    %cst_21 = arith.constant 1.000000e+00 : f32
    %41 = vector.broadcast %cst_21 : f32 to vector<8x96xf32>
    %42 = arith.addf %41, %40 : vector<8x96xf32>
    %43 = arith.divf %41, %42 : vector<8x96xf32>
    %44 = vector.extract_strided_slice %43 {offsets = [0, 0], sizes = [8, 32], strides = [1, 1]} : vector<8x96xf32> to vector<8x32xf32>
    %45 = vector.extract_strided_slice %43 {offsets = [0, 32], sizes = [8, 32], strides = [1, 1]} : vector<8x96xf32> to vector<8x32xf32>
    %46 = vector.extract_strided_slice %43 {offsets = [0, 64], sizes = [8, 32], strides = [1, 1]} : vector<8x96xf32> to vector<8x32xf32>
    %47 = vector.extract_strided_slice %37 {offsets = [0, 96], sizes = [8, 32], strides = [1, 1]} : vector<8x128xf32> to vector<8x32xf32>
    %48 = math.tanh %47 : vector<8x32xf32>
    %49 = arith.mulf %45, %30 : vector<8x32xf32>
    %50 = arith.mulf %44, %48 : vector<8x32xf32>
    %51 = arith.addf %49, %50 : vector<8x32xf32>
    %52 = math.tanh %51 : vector<8x32xf32>
    %53 = arith.mulf %46, %52 : vector<8x32xf32>
    %c2 = arith.constant 2 : index
    %c0_22 = arith.constant 0 : index
    %c0_23 = arith.constant 0 : index
    %54 = vector.load %arg11[%c2, %c0_22, %c0_23] : memref<8x8x128xf32, #tpu.memory_space<vmem>>, vector<1x8x128xf32>
    %55 = vector.shape_cast %54 : vector<1x8x128xf32> to vector<8x128xf32>
    %56 = arith.truncf %53 : vector<8x32xf32> to vector<8x32xbf16>
    %cst_24 = arith.constant dense<0.000000e+00> : vector<8x128xf32>
    %57 = tpu.matmul %56, %9, %cst_24 {dimension_numbers = #tpu.dot_dimension_numbers<[1], [0], [0], [1], [0, 0, 1, 1], [], []>} : vector<8x32xbf16>, vector<32x128xbf16>, vector<8x128xf32> -> vector<8x128xf32>
    %58 = arith.addf %55, %57 : vector<8x128xf32>
    %59 = vector.extract_strided_slice %58 {offsets = [0, 0], sizes = [8, 96], strides = [1, 1]} : vector<8x128xf32> to vector<8x96xf32>
    %60 = arith.negf %59 : vector<8x96xf32>
    %61 = math.exp %60 : vector<8x96xf32>
    %cst_25 = arith.constant 1.000000e+00 : f32
    %62 = vector.broadcast %cst_25 : f32 to vector<8x96xf32>
    %63 = arith.addf %62, %61 : vector<8x96xf32>
    %64 = arith.divf %62, %63 : vector<8x96xf32>
    %65 = vector.extract_strided_slice %64 {offsets = [0, 0], sizes = [8, 32], strides = [1, 1]} : vector<8x96xf32> to vector<8x32xf32>
    %66 = vector.extract_strided_slice %64 {offsets = [0, 32], sizes = [8, 32], strides = [1, 1]} : vector<8x96xf32> to vector<8x32xf32>
    %67 = vector.extract_strided_slice %64 {offsets = [0, 64], sizes = [8, 32], strides = [1, 1]} : vector<8x96xf32> to vector<8x32xf32>
    %68 = vector.extract_strided_slice %58 {offsets = [0, 96], sizes = [8, 32], strides = [1, 1]} : vector<8x128xf32> to vector<8x32xf32>
    %69 = math.tanh %68 : vector<8x32xf32>
    %70 = arith.mulf %66, %51 : vector<8x32xf32>
    %71 = arith.mulf %65, %69 : vector<8x32xf32>
    %72 = arith.addf %70, %71 : vector<8x32xf32>
    %73 = math.tanh %72 : vector<8x32xf32>
    %74 = arith.mulf %67, %73 : vector<8x32xf32>
    %c3 = arith.constant 3 : index
    %c0_26 = arith.constant 0 : index
    %c0_27 = arith.constant 0 : index
    %75 = vector.load %arg11[%c3, %c0_26, %c0_27] : memref<8x8x128xf32, #tpu.memory_space<vmem>>, vector<1x8x128xf32>
    %76 = vector.shape_cast %75 : vector<1x8x128xf32> to vector<8x128xf32>
    %77 = arith.truncf %74 : vector<8x32xf32> to vector<8x32xbf16>
    %cst_28 = arith.constant dense<0.000000e+00> : vector<8x128xf32>
    %78 = tpu.matmul %77, %9, %cst_28 {dimension_numbers = #tpu.dot_dimension_numbers<[1], [0], [0], [1], [0, 0, 1, 1], [], []>} : vector<8x32xbf16>, vector<32x128xbf16>, vector<8x128xf32> -> vector<8x128xf32>
    %79 = arith.addf %76, %78 : vector<8x128xf32>
    %80 = vector.extract_strided_slice %79 {offsets = [0, 0], sizes = [8, 96], strides = [1, 1]} : vector<8x128xf32> to vector<8x96xf32>
    %81 = arith.negf %80 : vector<8x96xf32>
    %82 = math.exp %81 : vector<8x96xf32>
    %cst_29 = arith.constant 1.000000e+00 : f32
    %83 = vector.broadcast %cst_29 : f32 to vector<8x96xf32>
    %84 = arith.addf %83, %82 : vector<8x96xf32>
    %85 = arith.divf %83, %84 : vector<8x96xf32>
    %86 = vector.extract_strided_slice %85 {offsets = [0, 0], sizes = [8, 32], strides = [1, 1]} : vector<8x96xf32> to vector<8x32xf32>
    %87 = vector.extract_strided_slice %85 {offsets = [0, 32], sizes = [8, 32], strides = [1, 1]} : vector<8x96xf32> to vector<8x32xf32>
    %88 = vector.extract_strided_slice %85 {offsets = [0, 64], sizes = [8, 32], strides = [1, 1]} : vector<8x96xf32> to vector<8x32xf32>
    %89 = vector.extract_strided_slice %79 {offsets = [0, 96], sizes = [8, 32], strides = [1, 1]} : vector<8x128xf32> to vector<8x32xf32>
    %90 = math.tanh %89 : vector<8x32xf32>
    %91 = arith.mulf %87, %72 : vector<8x32xf32>
    %92 = arith.mulf %86, %90 : vector<8x32xf32>
    %93 = arith.addf %91, %92 : vector<8x32xf32>
    %94 = math.tanh %93 : vector<8x32xf32>
    %95 = arith.mulf %88, %94 : vector<8x32xf32>
    %c4 = arith.constant 4 : index
    %c0_30 = arith.constant 0 : index
    %c0_31 = arith.constant 0 : index
    %96 = vector.load %arg11[%c4, %c0_30, %c0_31] : memref<8x8x128xf32, #tpu.memory_space<vmem>>, vector<1x8x128xf32>
    %97 = vector.shape_cast %96 : vector<1x8x128xf32> to vector<8x128xf32>
    %98 = arith.truncf %95 : vector<8x32xf32> to vector<8x32xbf16>
    %cst_32 = arith.constant dense<0.000000e+00> : vector<8x128xf32>
    %99 = tpu.matmul %98, %9, %cst_32 {dimension_numbers = #tpu.dot_dimension_numbers<[1], [0], [0], [1], [0, 0, 1, 1], [], []>} : vector<8x32xbf16>, vector<32x128xbf16>, vector<8x128xf32> -> vector<8x128xf32>
    %100 = arith.addf %97, %99 : vector<8x128xf32>
    %101 = vector.extract_strided_slice %100 {offsets = [0, 0], sizes = [8, 96], strides = [1, 1]} : vector<8x128xf32> to vector<8x96xf32>
    %102 = arith.negf %101 : vector<8x96xf32>
    %103 = math.exp %102 : vector<8x96xf32>
    %cst_33 = arith.constant 1.000000e+00 : f32
    %104 = vector.broadcast %cst_33 : f32 to vector<8x96xf32>
    %105 = arith.addf %104, %103 : vector<8x96xf32>
    %106 = arith.divf %104, %105 : vector<8x96xf32>
    %107 = vector.extract_strided_slice %106 {offsets = [0, 0], sizes = [8, 32], strides = [1, 1]} : vector<8x96xf32> to vector<8x32xf32>
    %108 = vector.extract_strided_slice %106 {offsets = [0, 32], sizes = [8, 32], strides = [1, 1]} : vector<8x96xf32> to vector<8x32xf32>
    %109 = vector.extract_strided_slice %106 {offsets = [0, 64], sizes = [8, 32], strides = [1, 1]} : vector<8x96xf32> to vector<8x32xf32>
    %110 = vector.extract_strided_slice %100 {offsets = [0, 96], sizes = [8, 32], strides = [1, 1]} : vector<8x128xf32> to vector<8x32xf32>
    %111 = math.tanh %110 : vector<8x32xf32>
    %112 = arith.mulf %108, %93 : vector<8x32xf32>
    %113 = arith.mulf %107, %111 : vector<8x32xf32>
    %114 = arith.addf %112, %113 : vector<8x32xf32>
    %115 = math.tanh %114 : vector<8x32xf32>
    %116 = arith.mulf %109, %115 : vector<8x32xf32>
    %c5 = arith.constant 5 : index
    %c0_34 = arith.constant 0 : index
    %c0_35 = arith.constant 0 : index
    %117 = vector.load %arg11[%c5, %c0_34, %c0_35] : memref<8x8x128xf32, #tpu.memory_space<vmem>>, vector<1x8x128xf32>
    %118 = vector.shape_cast %117 : vector<1x8x128xf32> to vector<8x128xf32>
    %119 = arith.truncf %116 : vector<8x32xf32> to vector<8x32xbf16>
    %cst_36 = arith.constant dense<0.000000e+00> : vector<8x128xf32>
    %120 = tpu.matmul %119, %9, %cst_36 {dimension_numbers = #tpu.dot_dimension_numbers<[1], [0], [0], [1], [0, 0, 1, 1], [], []>} : vector<8x32xbf16>, vector<32x128xbf16>, vector<8x128xf32> -> vector<8x128xf32>
    %121 = arith.addf %118, %120 : vector<8x128xf32>
    %122 = vector.extract_strided_slice %121 {offsets = [0, 0], sizes = [8, 96], strides = [1, 1]} : vector<8x128xf32> to vector<8x96xf32>
    %123 = arith.negf %122 : vector<8x96xf32>
    %124 = math.exp %123 : vector<8x96xf32>
    %cst_37 = arith.constant 1.000000e+00 : f32
    %125 = vector.broadcast %cst_37 : f32 to vector<8x96xf32>
    %126 = arith.addf %125, %124 : vector<8x96xf32>
    %127 = arith.divf %125, %126 : vector<8x96xf32>
    %128 = vector.extract_strided_slice %127 {offsets = [0, 0], sizes = [8, 32], strides = [1, 1]} : vector<8x96xf32> to vector<8x32xf32>
    %129 = vector.extract_strided_slice %127 {offsets = [0, 32], sizes = [8, 32], strides = [1, 1]} : vector<8x96xf32> to vector<8x32xf32>
    %130 = vector.extract_strided_slice %127 {offsets = [0, 64], sizes = [8, 32], strides = [1, 1]} : vector<8x96xf32> to vector<8x32xf32>
    %131 = vector.extract_strided_slice %121 {offsets = [0, 96], sizes = [8, 32], strides = [1, 1]} : vector<8x128xf32> to vector<8x32xf32>
    %132 = math.tanh %131 : vector<8x32xf32>
    %133 = arith.mulf %129, %114 : vector<8x32xf32>
    %134 = arith.mulf %128, %132 : vector<8x32xf32>
    %135 = arith.addf %133, %134 : vector<8x32xf32>
    %136 = math.tanh %135 : vector<8x32xf32>
    %137 = arith.mulf %130, %136 : vector<8x32xf32>
    %c6 = arith.constant 6 : index
    %c0_38 = arith.constant 0 : index
    %c0_39 = arith.constant 0 : index
    %138 = vector.load %arg11[%c6, %c0_38, %c0_39] : memref<8x8x128xf32, #tpu.memory_space<vmem>>, vector<1x8x128xf32>
    %139 = vector.shape_cast %138 : vector<1x8x128xf32> to vector<8x128xf32>
    %140 = arith.truncf %137 : vector<8x32xf32> to vector<8x32xbf16>
    %cst_40 = arith.constant dense<0.000000e+00> : vector<8x128xf32>
    %141 = tpu.matmul %140, %9, %cst_40 {dimension_numbers = #tpu.dot_dimension_numbers<[1], [0], [0], [1], [0, 0, 1, 1], [], []>} : vector<8x32xbf16>, vector<32x128xbf16>, vector<8x128xf32> -> vector<8x128xf32>
    %142 = arith.addf %139, %141 : vector<8x128xf32>
    %143 = vector.extract_strided_slice %142 {offsets = [0, 0], sizes = [8, 96], strides = [1, 1]} : vector<8x128xf32> to vector<8x96xf32>
    %144 = arith.negf %143 : vector<8x96xf32>
    %145 = math.exp %144 : vector<8x96xf32>
    %cst_41 = arith.constant 1.000000e+00 : f32
    %146 = vector.broadcast %cst_41 : f32 to vector<8x96xf32>
    %147 = arith.addf %146, %145 : vector<8x96xf32>
    %148 = arith.divf %146, %147 : vector<8x96xf32>
    %149 = vector.extract_strided_slice %148 {offsets = [0, 0], sizes = [8, 32], strides = [1, 1]} : vector<8x96xf32> to vector<8x32xf32>
    %150 = vector.extract_strided_slice %148 {offsets = [0, 32], sizes = [8, 32], strides = [1, 1]} : vector<8x96xf32> to vector<8x32xf32>
    %151 = vector.extract_strided_slice %148 {offsets = [0, 64], sizes = [8, 32], strides = [1, 1]} : vector<8x96xf32> to vector<8x32xf32>
    %152 = vector.extract_strided_slice %142 {offsets = [0, 96], sizes = [8, 32], strides = [1, 1]} : vector<8x128xf32> to vector<8x32xf32>
    %153 = math.tanh %152 : vector<8x32xf32>
    %154 = arith.mulf %150, %135 : vector<8x32xf32>
    %155 = arith.mulf %149, %153 : vector<8x32xf32>
    %156 = arith.addf %154, %155 : vector<8x32xf32>
    %157 = math.tanh %156 : vector<8x32xf32>
    %158 = arith.mulf %151, %157 : vector<8x32xf32>
    %c7 = arith.constant 7 : index
    %c0_42 = arith.constant 0 : index
    %c0_43 = arith.constant 0 : index
    %159 = vector.load %arg11[%c7, %c0_42, %c0_43] : memref<8x8x128xf32, #tpu.memory_space<vmem>>, vector<1x8x128xf32>
    %160 = vector.shape_cast %159 : vector<1x8x128xf32> to vector<8x128xf32>
    %161 = arith.truncf %158 : vector<8x32xf32> to vector<8x32xbf16>
    %cst_44 = arith.constant dense<0.000000e+00> : vector<8x128xf32>
    %162 = tpu.matmul %161, %9, %cst_44 {dimension_numbers = #tpu.dot_dimension_numbers<[1], [0], [0], [1], [0, 0, 1, 1], [], []>} : vector<8x32xbf16>, vector<32x128xbf16>, vector<8x128xf32> -> vector<8x128xf32>
    %163 = arith.addf %160, %162 : vector<8x128xf32>
    %164 = vector.extract_strided_slice %163 {offsets = [0, 0], sizes = [8, 96], strides = [1, 1]} : vector<8x128xf32> to vector<8x96xf32>
    %165 = arith.negf %164 : vector<8x96xf32>
    %166 = math.exp %165 : vector<8x96xf32>
    %cst_45 = arith.constant 1.000000e+00 : f32
    %167 = vector.broadcast %cst_45 : f32 to vector<8x96xf32>
    %168 = arith.addf %167, %166 : vector<8x96xf32>
    %169 = arith.divf %167, %168 : vector<8x96xf32>
    %170 = vector.extract_strided_slice %169 {offsets = [0, 0], sizes = [8, 32], strides = [1, 1]} : vector<8x96xf32> to vector<8x32xf32>
    %171 = vector.extract_strided_slice %169 {offsets = [0, 32], sizes = [8, 32], strides = [1, 1]} : vector<8x96xf32> to vector<8x32xf32>
    %172 = vector.extract_strided_slice %169 {offsets = [0, 64], sizes = [8, 32], strides = [1, 1]} : vector<8x96xf32> to vector<8x32xf32>
    %173 = vector.extract_strided_slice %163 {offsets = [0, 96], sizes = [8, 32], strides = [1, 1]} : vector<8x128xf32> to vector<8x32xf32>
    %174 = math.tanh %173 : vector<8x32xf32>
    %175 = arith.mulf %171, %156 : vector<8x32xf32>
    %176 = arith.mulf %170, %174 : vector<8x32xf32>
    %177 = arith.addf %175, %176 : vector<8x32xf32>
    %178 = math.tanh %177 : vector<8x32xf32>
    %179 = arith.mulf %172, %178 : vector<8x32xf32>
    %c7_46 = arith.constant 7 : index
    %c0_47 = arith.constant 0 : index
    %c0_48 = arith.constant 0 : index
    %180 = vector.load %arg1[%c7_46, %c0_47, %c0_48] : memref<8x8x16xbf16, #tpu.memory_space<vmem>>, vector<1x8x16xbf16>
    %181 = vector.shape_cast %180 : vector<1x8x16xbf16> to vector<8x16xbf16>
    %c0_49 = arith.constant 0 : index
    %c0_50 = arith.constant 0 : index
    %182 = vector.load %arg5[%c0_49, %c0_50] : memref<16x128xbf16, #tpu.memory_space<vmem>>, vector<16x128xbf16>
    %cst_51 = arith.constant dense<0.000000e+00> : vector<8x128xf32>
    %183 = tpu.matmul %181, %182, %cst_51 {dimension_numbers = #tpu.dot_dimension_numbers<[1], [0], [0], [1], [0, 0, 1, 1], [], []>} : vector<8x16xbf16>, vector<16x128xbf16>, vector<8x128xf32> -> vector<8x128xf32>
    %c0_52 = arith.constant 0 : index
    %c0_53 = arith.constant 0 : index
    %184 = vector.load %arg6[%c0_52, %c0_53] : memref<1x128xf32, #tpu.memory_space<vmem>>, vector<1x128xf32>
    %185 = vector.broadcast %184 : vector<1x128xf32> to vector<8x128xf32>
    %186 = arith.addf %183, %185 : vector<8x128xf32>
    %187 = vector.extract_strided_slice %186 {offsets = [0, 0], sizes = [8, 96], strides = [1, 1]} : vector<8x128xf32> to vector<8x96xf32>
    %188 = arith.negf %187 : vector<8x96xf32>
    %189 = math.exp %188 : vector<8x96xf32>
    %cst_54 = arith.constant 1.000000e+00 : f32
    %190 = vector.broadcast %cst_54 : f32 to vector<8x96xf32>
    %191 = arith.addf %190, %189 : vector<8x96xf32>
    %192 = arith.divf %190, %191 : vector<8x96xf32>
    %193 = vector.extract_strided_slice %192 {offsets = [0, 0], sizes = [8, 32], strides = [1, 1]} : vector<8x96xf32> to vector<8x32xf32>
    %194 = vector.extract_strided_slice %192 {offsets = [0, 64], sizes = [8, 32], strides = [1, 1]} : vector<8x96xf32> to vector<8x32xf32>
    %195 = vector.extract_strided_slice %186 {offsets = [0, 96], sizes = [8, 32], strides = [1, 1]} : vector<8x128xf32> to vector<8x32xf32>
    %196 = math.tanh %195 : vector<8x32xf32>
    %197 = arith.mulf %193, %196 : vector<8x32xf32>
    %198 = math.tanh %197 : vector<8x32xf32>
    %199 = arith.mulf %194, %198 : vector<8x32xf32>
    %200 = arith.truncf %179 : vector<8x32xf32> to vector<8x32xbf16>
    %c0_55 = arith.constant 0 : index
    %c0_56 = arith.constant 0 : index
    %201 = vector.load %arg7[%c0_55, %c0_56] : memref<32x128xbf16, #tpu.memory_space<vmem>>, vector<32x128xbf16>
    %cst_57 = arith.constant dense<0.000000e+00> : vector<8x128xf32>
    %202 = tpu.matmul %200, %201, %cst_57 {dimension_numbers = #tpu.dot_dimension_numbers<[1], [0], [0], [1], [0, 0, 1, 1], [], []>} : vector<8x32xbf16>, vector<32x128xbf16>, vector<8x128xf32> -> vector<8x128xf32>
    %203 = arith.truncf %199 : vector<8x32xf32> to vector<8x32xbf16>
    %c0_58 = arith.constant 0 : index
    %c0_59 = arith.constant 0 : index
    %204 = vector.load %arg8[%c0_58, %c0_59] : memref<32x128xbf16, #tpu.memory_space<vmem>>, vector<32x128xbf16>
    %cst_60 = arith.constant dense<0.000000e+00> : vector<8x128xf32>
    %205 = tpu.matmul %203, %204, %cst_60 {dimension_numbers = #tpu.dot_dimension_numbers<[1], [0], [0], [1], [0, 0, 1, 1], [], []>} : vector<8x32xbf16>, vector<32x128xbf16>, vector<8x128xf32> -> vector<8x128xf32>
    %206 = arith.addf %202, %205 : vector<8x128xf32>
    %c0_61 = arith.constant 0 : index
    %c0_62 = arith.constant 0 : index
    %207 = vector.load %arg9[%c0_61, %c0_62] : memref<1x128xf32, #tpu.memory_space<vmem>>, vector<1x128xf32>
    %208 = vector.broadcast %207 : vector<1x128xf32> to vector<8x128xf32>
    %209 = arith.addf %206, %208 : vector<8x128xf32>
    %c0_63 = arith.constant 0 : index
    %c0_64 = arith.constant 0 : index
    %210 = vector.load %arg10[%c0_63, %c0_64] : memref<8x128xf32, #tpu.memory_space<vmem>>, vector<8x128xf32>
    tpu.vector_store %arg10[%c0_63, %c0_64], %209 {strides = array<i32>} : memref<8x128xf32, #tpu.memory_space<vmem>>, vector<8x128xf32>,
    return
  }
  func.func @transform_0(%arg0: i32) -> (i32, i32, i32) {
    %c0_i32 = arith.constant 0 : i32
    %c0_i32_0 = arith.constant 0 : i32
    %c0_i32_1 = arith.constant 0 : i32
    return %c0_i32, %arg0, %c0_i32_0 : i32, i32, i32
  }
  func.func @transform_1(%arg0: i32) -> (i32, i32) {
    %c0_i32 = arith.constant 0 : i32
    %c0_i32_0 = arith.constant 0 : i32
    %c0_i32_1 = arith.constant 0 : i32
    return %c0_i32, %c0_i32_0 : i32, i32
  }
  func.func @transform_2(%arg0: i32) -> (i32, i32) {
    %c0_i32 = arith.constant 0 : i32
    %c0_i32_0 = arith.constant 0 : i32
    %c0_i32_1 = arith.constant 0 : i32
    return %c0_i32, %c0_i32_0 : i32, i32
  }
  func.func @transform_3(%arg0: i32) -> (i32, i32) {
    %c0_i32 = arith.constant 0 : i32
    %c0_i32_0 = arith.constant 0 : i32
    %c0_i32_1 = arith.constant 0 : i32
    return %c0_i32, %c0_i32_0 : i32, i32
  }
  func.func @transform_4(%arg0: i32) -> (i32, i32) {
    %c0_i32 = arith.constant 0 : i32
    %c0_i32_0 = arith.constant 0 : i32
    %c0_i32_1 = arith.constant 0 : i32
    return %c0_i32, %c0_i32_0 : i32, i32
  }
  func.func @transform_5(%arg0: i32) -> (i32, i32) {
    %c0_i32 = arith.constant 0 : i32
    %c0_i32_0 = arith.constant 0 : i32
    %c0_i32_1 = arith.constant 0 : i32
    return %c0_i32, %c0_i32_0 : i32, i32
  }
  func.func @transform_6(%arg0: i32) -> (i32, i32) {
    %c0_i32 = arith.constant 0 : i32
    %c0_i32_0 = arith.constant 0 : i32
    %c0_i32_1 = arith.constant 0 : i32
    return %c0_i32, %c0_i32_0 : i32, i32
  }
  func.func @transform_7(%arg0: i32) -> (i32, i32) {
    %c0_i32 = arith.constant 0 : i32
    %c0_i32_0 = arith.constant 0 : i32
    %c0_i32_1 = arith.constant 0 : i32
    return %c0_i32, %c0_i32_0 : i32, i32
  }
  func.func @transform_8(%arg0: i32) -> (i32, i32) {
    %c0_i32 = arith.constant 0 : i32
    %c0_i32_0 = arith.constant 0 : i32
    %c0_i32_1 = arith.constant 0 : i32
    return %c0_i32, %c0_i32_0 : i32, i32
  }
  func.func @transform_9(%arg0: i32) -> (i32, i32) {
    %c0_i32 = arith.constant 0 : i32
    %c0_i32_0 = arith.constant 0 : i32
    return %arg0, %c0_i32 : i32, i32
  }
}

</mosaic_0001>

<bundles_post_ra>
// kernel: tpu_custom_call.1
= control target key start
LH: loop header
LB: loop body
LE: loop exit
PB: predicated region body
PF: predicated region fallthrough
CT: control target
= control target key end

     0   :  { %14 = vsyncpa [#allocation4], 0  ;;  %s1790_s0 = inlined_call_operand.hbm [shape: bf16[8,8,16], index: 0, kind: input, shape index: {}]   ;;  %s1791_s1 = inlined_call_operand.hbm [shape: bf16[16,128], index: 1, kind: input, shape index: {}]   ;;  %s1792_s2 = inlined_call_operand.vmem [shape: f32[1,128], index: 2, kind: input, shape index: {}]   ;;  %s1793_s3 = inlined_call_operand.hbm [shape: bf16[32,128], index: 3, kind: input, shape index: {}]   ;;  %s1794_s4 = inlined_call_operand.hbm [shape: bf16[16,128], index: 4, kind: input, shape index: {}]   ;;  %s1795_s5 = inlined_call_operand.vmem [shape: f32[1,128], index: 5, kind: input, shape index: {}]   ;;  %s1796_s6 = inlined_call_operand.vmem [shape: bf16[32,128], index: 6, kind: input, shape index: {}]   ;;  %s1797_s7 = inlined_call_operand.hbm [shape: bf16[32,128], index: 7, kind: input, shape index: {}]   ;;  %s1798_s8 = inlined_call_operand.vmem [shape: f32[1,128], index: 8, kind: input, shape index: {}]   ;;  %s1799_s9 = inlined_call_operand.hbm [shape: f32[8,128], index: 9, kind: output, shape index: {}]  }
   0x1   :  { %15 = vsyncpa [#allocation7], 0 }
   0x2   :  { %16 = vsyncpa [#allocation10], 0 }
   0x3   :  { %17 = vsyncpa [#allocation5], 0  ;;  %s1472_s30 = smov [#allocation6]   ;;  %s1473_s11 = smov [#allocation9]  }
   0x4   :  { %s35_s10 = sshll.u32 %s1472_s30, 4  ;;  %s61_s12 = sshll.u32 %s1473_s11, 4  ;;  %s36_s10 = int_to_ptr.vmem [resolvable:$true] %s35_s10  ;;  %s1534_s12 = int_to_ptr.vmem [resolvable:$true] %s61_s12 }
   0x5   :  { %s1332_s15 = scalar_lea.hbm %s1791_s1, 128 }
   0x6   :  { %p1333_p0 = scmp.ne.s32.totalorder %s1791_s1, %s1332_s15  ;;  %p1336_p1 = scmp.lt.u32.totalorder %s1332_s15, %s1791_s1 }
   0x8   :  { %p1338_p2 = pnand %p1336_p1, %p1333_p0 }
   0xa   :  { %1341 = shalt.err (!%p1338_p2)
}
   0xb   :  { %s1342_s20 = scalar_lea.vmem %s36_s10, 128  ;;  %p1347_p4 = scmp.lt.s32.totalorder %s36_s10, %s36_s10 }
   0xc   :  { %p1343_p3 = scmp.ne.s32.totalorder %s36_s10, %s1342_s20  ;;  %p1348_p5 = scmp.lt.s32.totalorder %s1342_s20, %s1342_s20 }
   0xe   :  { %p1349_p6 = por %p1348_p5, %p1347_p4 }
  0x10   :  { %p1350_p7 = pnand %p1349_p6, %p1343_p3 }
  0x12   :  { %1353 = shalt.err (!%p1350_p7)
}
  0x13   :  { %s1474_s21 = smov 64   ;;  %s1475_s22 = smov 4  }
  0x14   :  { %41 = dma.hbm_to_vmem [thread:$0]  %s1791_s1, 128, %s36_s10, [#allocation7], %s1474_s21, %s1474_s21, %s1475_s22  }
  0x15   :  { %s1354_s27 = scalar_lea.hbm %s1794_s4, 128 }
  0x16   :  { %p1355_p8 = scmp.ne.s32.totalorder %s1794_s4, %s1354_s27  ;;  %p1358_p9 = scmp.lt.u32.totalorder %s1354_s27, %s1794_s4 }
  0x18   :  { %p1360_p10 = pnand %p1358_p9, %p1355_p8 }
  0x1a   :  { %1363 = shalt.err (!%p1360_p10)
}
  0x1b   :  { %s1364_s13 = scalar_lea.vmem %s1534_s12, 128  ;;  %p1369_p12 = scmp.lt.s32.totalorder %s1534_s12, %s1534_s12 }
  0x1c   :  { %p1365_p11 = scmp.ne.s32.totalorder %s1534_s12, %s1364_s13  ;;  %p1370_p13 = scmp.lt.s32.totalorder %s1364_s13, %s1364_s13 }
  0x1e   :  { %p1371_p0 = por %p1370_p13, %p1369_p12 }
  0x20   :  { %p1372_p1 = pnand %p1371_p0, %p1365_p11 }
  0x22   :  { %1375 = shalt.err (!%p1372_p1)
}
  0x23   :  { %67 = dma.hbm_to_vmem [thread:$0]  %s1794_s4, 128, %s1534_s12, [#allocation10], %s1474_s21, %s1474_s21, %s1475_s22  }
  0x24   :  { %s1476_s14 = smov [#allocation3]   ;;  %s1477_s16 = smov [#allocation8]  }
  0x25   :  { %s23_s15 = sshll.u32 %s1476_s14, 4  ;;  %s49_s17 = sshll.u32 %s1477_s16, 4  ;;  %s24_s15 = int_to_ptr.vmem [resolvable:$true] %s23_s15  ;;  %s1571_s17 = int_to_ptr.vmem [resolvable:$true] %s49_s17 }
  0x26   :  { %s1376_s20 = scalar_lea.hbm %s1790_s0, 512 }
  0x27   :  { %p1377_p2 = scmp.ne.s32.totalorder %s1790_s0, %s1376_s20  ;;  %p1380_p3 = scmp.lt.u32.totalorder %s1376_s20, %s1790_s0 }
  0x29   :  { %p1382_p4 = pnand %p1380_p3, %p1377_p2 }
  0x2b   :  { %1385 = shalt.err (!%p1382_p4)
}
  0x2c   :  { %s1386_s4 = scalar_lea.vmem %s24_s15, 512  ;;  %p1391_p6 = scmp.lt.s32.totalorder %s24_s15, %s24_s15 }
  0x2d   :  { %p1387_p5 = scmp.ne.s32.totalorder %s24_s15, %s1386_s4  ;;  %p1392_p7 = scmp.lt.s32.totalorder %s1386_s4, %s1386_s4 }
  0x2f   :  { %p1393_p8 = por %p1392_p7, %p1391_p6 }
  0x31   :  { %p1394_p9 = pnand %p1393_p8, %p1387_p5 }
  0x33   :  { %1397 = shalt.err (!%p1394_p9)
}
  0x34   :  { %29 = dma.hbm_to_vmem [thread:$0]  %s1790_s0, 512, %s24_s15, [#allocation4], %s1474_s21, %s1474_s21, %s1475_s22  }
  0x35   :  { %s1398_s30 = scalar_lea.hbm %s1793_s3, 256 }
  0x36   :  { %p1399_p10 = scmp.ne.s32.totalorder %s1793_s3, %s1398_s30  ;;  %p1402_p11 = scmp.lt.u32.totalorder %s1398_s30, %s1793_s3 }
  0x38   :  { %p1404_p12 = pnand %p1402_p11, %p1399_p10 }
  0x3a   :  { %1407 = shalt.err (!%p1404_p12)
}
  0x3b   :  { %s1408_s14 = scalar_lea.vmem %s1571_s17, 256  ;;  %p1413_p0 = scmp.lt.s32.totalorder %s1571_s17, %s1571_s17 }
  0x3c   :  { %p1409_p13 = scmp.ne.s32.totalorder %s1571_s17, %s1408_s14  ;;  %p1414_p1 = scmp.lt.s32.totalorder %s1408_s14, %s1408_s14 }
  0x3e   :  { %p1415_p2 = por %p1414_p1, %p1413_p0 }
  0x40   :  { %p1416_p3 = pnand %p1415_p2, %p1409_p13 }
  0x42   :  { %1419 = shalt.err (!%p1416_p3)
}
  0x43   :  { %55 = dma.hbm_to_vmem [thread:$0]  %s1793_s3, 256, %s1571_s17, [#allocation7], %s1474_s21, %s1474_s21, %s1475_s22  }
  0x44   :  { %s1478_s16 = smov [#allocation11]   ;;  %s1420_s23 = scalar_lea.hbm %s1797_s7, 256 }
  0x45   :  { %s77_s18 = sshll.u32 %s1478_s16, 4  ;;  %p1421_p4 = scmp.ne.s32.totalorder %s1797_s7, %s1420_s23  ;;  %s78_s18 = int_to_ptr.vmem [resolvable:$true] %s77_s18 }
  0x46   :  { %p1424_p5 = scmp.lt.u32.totalorder %s1420_s23, %s1797_s7 }
  0x48   :  { %p1426_p6 = pnand %p1424_p5, %p1421_p4 }
  0x4a   :  { %1429 = shalt.err (!%p1426_p6)
}
  0x4b   :  { %s1430_s12 = scalar_lea.vmem %s78_s18, 256  ;;  %p1435_p8 = scmp.lt.s32.totalorder %s78_s18, %s78_s18 }
  0x4c   :  { %p1431_p7 = scmp.ne.s32.totalorder %s78_s18, %s1430_s12  ;;  %p1436_p9 = scmp.lt.s32.totalorder %s1430_s12, %s1430_s12 }
  0x4e   :  { %p1437_p10 = por %p1436_p9, %p1435_p8 }
  0x50   :  { %p1438_p11 = pnand %p1437_p10, %p1431_p7 }
  0x52   :  { %1441 = shalt.err (!%p1438_p11)
}
  0x53   :  { %83 = dma.hbm_to_vmem [thread:$0]  %s1797_s7, 256, %s78_s18, [#allocation10], %s1474_s21, %s1474_s21, %s1475_s22  }
  0x54   :  { %1464 = dma.done.wait [#allocation4], 512  }
  0x55   :  { %1465 = vsyncadd [#allocation4], 4294966784 }
  0x56   :  { %1466 = dma.done.wait [#allocation7], 384  }
  0x57   :  { %1467 = vsyncadd [#allocation7], 4294966912 }
  0x58   :  { %1468 = dma.done.wait [#allocation10], 384  }
  0x59   :  { %1469 = vsyncadd [#allocation10], 4294966912  ;;  %v1479_v0 = vmov 0.0   ;;  %vm1480_vm0 = vmmov 0   ;;  %v1248_v1 = vld [vmem:[#allocation6] sm:$0xff]   ;;  %v1626_v2 = vld [vmem:[#allocation8] sm:$0xff]  }
  0x5a   :  { %1150 = vmatprep.subr.bf16.mxu1 %v1479_v0  ;;  %1154 = vmatprep.mubr.msk.bf16.mxu1 %vm1480_vm0, %v1479_v0  ;;  %vm145_vm1 = vcmask 130048   ;;  %v1250_v3 = vld [vmem:[#allocation3] sm:$0xff]   ;;  %v1251_v4 = vld [vmem:[#allocation3 + $0x8] sm:$0xff]   ;;  %v1631_v5 = vld [vmem:[#allocation8 + $0x8] sm:$0xff]   ;;  %v1481_v6 = vmov 0   ;;  %s1482_s27 = smov 32  }
  0x5b   :  { %1140 = vmatprep.subr.bf16.mxu0 %v1248_v1  ;;  %1151 = vmatpush3.bf16.msra.mxu1 %v1626_v2  ;;  %v1650_v7 = vld [vmem:[%s1792_s2] ss:$0 sm:$0xff]  ;;  %vm248_vm2 = vcmask 261120   ;;  %v1253_v49 = vld [vmem:[#allocation3 + $0x10] sm:$0xff]   ;;  %v1254_v50 = vld [vmem:[#allocation3 + $0x18] sm:$0xff]   ;;  %s1483_s1 = smov [#allocation12]  }
  0x5c   :  { %1141 = vmatpush3.bf16.msra.mxu0 %v1248_v1  ;;  %1142 = vmatprep.mubr.msk.bf16.mxu0 %vm145_vm1, %v1250_v3  ;;  %s1054_s10 = sshll.u32 %s1483_s1, 4  ;;  %s1055_s10 = int_to_ptr.vmem [resolvable:$true] %s1054_s10 }
  0x5d   :  { %1152 = vmatprep.subr.bf16.mxu1 %v1479_v0  ;;  %1166 = vmatprep.subr.bf16.mxu0 %v1479_v0  ;;  %p1447_p13 = scmp.lt.s32.totalorder %s1055_s10, %s1055_s10 }
  0x5f   :  { %1143 = vmatmul.mubr.msk.bf16.vlgmr.msra.gmra.mrb[0].mxu0 %vm145_vm1, %v1251_v4  ;;  %1153 = vmatpush3.bf16.msra.mxu1 %v1631_v5 }
  0x60   :  { %1167 = vmatpush3.bf16.msra.mxu0 %v1626_v2  ;;  %1158 = vmatprep.subr.bf16.mxu1 %v1479_v0 }
  0x61   :  { %1168 = vmatprep.subr.bf16.mxu0 %v1479_v0  ;;  %1146 = vmatprep.mubr.msk.bf16.mxu0 %vm145_vm1, %v1253_v49 }
  0x62   :  { %1155 = vmatmul.mubr.bf16.vlgmr.msra.gmra.mrb[0].mxu1 %v1481_v6 }
  0x63   :  { %1159 = vmatpush3.bf16.msra.mxu1 %v1626_v2  ;;  %1162 = vmatprep.mubr.msk.bf16.mxu1 %vm1480_vm0, %v1479_v0 }
  0x64   :  { %1160 = vmatprep.subr.bf16.mxu1 %v1479_v0  ;;  %1169 = vmatpush3.bf16.msra.mxu0 %v1631_v5 }
  0x65   :  { %1182 = vmatprep.subr.bf16.mxu0 %v1479_v0 }
  0x67   :  { %1161 = vmatpush3.bf16.msra.mxu1 %v1631_v5  ;;  %1147 = vmatmul.mubr.msk.bf16.gmra.mrb[4].mxu0 %vm145_vm1, %v1254_v50 }
  0x68   :  { %1174 = vmatprep.subr.bf16.mxu1 %v1479_v0  ;;  %1170 = vmatprep.mubr.msk.bf16.mxu0 %vm1480_vm0, %v1479_v0 }
 0x132   :  { %v1652_v8 = vpop.f32.mrb[0].mxu0 }
 0x133   :  { %v192_v9 = vpop.f32.mrb[1].mxu0  ;;  %v201_v60 = vadd.f32 %v1652_v8, %v1650_v7 }
 0x134   :  { %v193_v10 = vadd.f32 %v1650_v7, %v192_v9  ;;  %v1655_v11 = vpop.f32.mrb[2].mxu0 }
 0x135   :  { %v195_v12 = vpop.f32.mrb[3].mxu0  ;;  %v286_v13 = vpop.f32.mrb[0].mxu1 }
 0x136   :  { %v292_v14 = vadd.f32 %v286_v13, %v193_v10  ;;  %v1156_v15 = vpop.f32.mrb[1].mxu1  ;;  %v196_v33 = vadd.f32 %v1650_v7, %v195_v12 }
 0x137   :  { %v289_v16 = vpop.f32.mrb[2].mxu1 }
 0x138   :  { %1260 = vtanh.f32 %v292_v14  ;;  %v1157_v17 = vpop.f32.mrb[3].mxu1  ;;  %v1077_v19 = vmul.f32 -1.442695, %v292_v14 }
 0x13a   :  { %1262 = vpow2.f32 %v1077_v19  ;;  %v1677_v55 = vpop.f32.mrb[4].mxu0 }
 0x13b   :  { %v1679_v56 = vpop.f32.mrb[5].mxu0 }
 0x13c   :  { %v1681_v57 = vpop.f32.mrb[6].mxu0 }
 0x13d   :  { %v1683_v58 = vpop.f32.mrb[7].mxu0 }
 0x142   :  { %v1261_v18 = vpop.eup %1260 }
 0x143   :  { %302 = vrot.lane.b32.xlu0 %v1261_v18, %s1482_s27 }
 0x144   :  { %v1263_v20 = vpop.eup %1262 }
 0x145   :  { %v296_v21 = vadd.f32 1.0, %v1263_v20 }
 0x147   :  { %1264 = vrcp.f32 %v296_v21 }
 0x151   :  { %v1265_v22 = vpop.eup %1264 }
 0x152   :  { %v300_v25 = vmul.f32 0.0, %v1265_v22 }
 0x1b5   :  { %v303_v23 = vpop.permute.xlu0 %302 }
 0x1b6   :  { %v305_v24 = vmul.f32 %v1265_v22, %v303_v23 }
 0x1b8   :  { %307 = vrot.lane.b32.xlu0 %v305_v24, %s1482_s27 }
 0x22a   :  { %v308_v26 = vpop.permute.xlu0 %307 }
 0x22b   :  { %v310_v27 = vadd.f32 %v308_v26, %v300_v25 }
 0x22d   :  { %1266 = vtanh.f32 %v310_v27 }
 0x237   :  { %v1267_v28 = vpop.eup %1266 }
 0x238   :  { %313 = vrot.lane.b32.xlu1 %v1267_v28, %s1482_s27 }
 0x2aa   :  { %v314_v29 = vpop.permute.xlu1 %313 }
 0x2ab   :  { %v316_v30 = vmul.f32 %v1265_v22, %v314_v29  ;;  %v204_v22 = vadd.f32 %v1655_v11, %v1650_v7 }
 0x2ad   :  { %v319_v31 = vpack.c.bf16 %v316_v30, %v316_v30 }
 0x2af   :  { %321 = vrot.lane.b32.xlu1 %v319_v31, %s1474_s21 }
 0x321   :  { %v322_v32 = vpop.permute.xlu1 %321 }
 0x322   :  { %1163 = vmatmul.mubr.msk.bf16.vlgmr.msra.gmra.mrb[4].mxu1 %vm248_vm2, %v322_v32 }
 0x323   :  { %1175 = vmatpush3.bf16.msra.mxu1 %v1626_v2  ;;  %1178 = vmatprep.mubr.msk.bf16.mxu1 %vm1480_vm0, %v1479_v0 }
 0x324   :  { %1176 = vmatprep.subr.bf16.mxu1 %v1479_v0 }
 0x327   :  { %1177 = vmatpush3.bf16.msra.mxu1 %v1631_v5 }
 0x328   :  { %1190 = vmatprep.subr.bf16.mxu1 %v1479_v0 }
 0x3f5   :  { %v360_v34 = vpop.f32.mrb[4].mxu1 }
 0x3f6   :  { %v366_v35 = vadd.f32 %v360_v34, %v196_v33  ;;  %v1164_v36 = vpop.f32.mrb[5].mxu1 }
 0x3f7   :  { %v363_v37 = vpop.f32.mrb[6].mxu1 }
 0x3f8   :  { %1268 = vtanh.f32 %v366_v35  ;;  %v1165_v38 = vpop.f32.mrb[7].mxu1  ;;  %v1079_v40 = vmul.f32 -1.442695, %v366_v35 }
 0x3fa   :  { %1270 = vpow2.f32 %v1079_v40 }
 0x402   :  { %v1269_v39 = vpop.eup %1268 }
 0x403   :  { %376 = vrot.lane.b32.xlu0 %v1269_v39, %s1482_s27 }
 0x404   :  { %v1271_v41 = vpop.eup %1270 }
 0x405   :  { %v370_v42 = vadd.f32 1.0, %v1271_v41 }
 0x407   :  { %1272 = vrcp.f32 %v370_v42  ;;  %v209_v42 = vadd.f32 %v1650_v7, %v1679_v56 }
 0x411   :  { %v1273_v43 = vpop.eup %1272 }
 0x412   :  { %v374_v46 = vmul.f32 %v1273_v43, %v310_v27 }
 0x475   :  { %v377_v44 = vpop.permute.xlu0 %376 }
 0x476   :  { %v379_v45 = vmul.f32 %v1273_v43, %v377_v44 }
 0x478   :  { %381 = vrot.lane.b32.xlu1 %v379_v45, %s1482_s27 }
 0x4ea   :  { %v382_v47 = vpop.permute.xlu1 %381 }
 0x4eb   :  { %v384_v48 = vadd.f32 %v382_v47, %v374_v46 }
 0x4ed   :  { %1274 = vtanh.f32 %v384_v48 }
 0x4f7   :  { %v1275_v51 = vpop.eup %1274 }
 0x4f8   :  { %387 = vrot.lane.b32.xlu0 %v1275_v51, %s1482_s27 }
 0x56a   :  { %v388_v52 = vpop.permute.xlu0 %387 }
 0x56b   :  { %v390_v53 = vmul.f32 %v1273_v43, %v388_v52 }
 0x56d   :  { %v393_v54 = vpack.c.bf16 %v390_v53, %v390_v53 }
 0x56f   :  { %395 = vrot.lane.b32.xlu1 %v393_v54, %s1474_s21 }
 0x5e1   :  { %v396_v59 = vpop.permute.xlu1 %395 }
 0x5e2   :  { %1171 = vmatmul.mubr.msk.bf16.vlgmr.msra.gmra.mrb[8].mxu0 %vm248_vm2, %v396_v59 }
 0x5e3   :  { %1183 = vmatpush3.bf16.msra.mxu0 %v1626_v2  ;;  %1186 = vmatprep.mubr.msk.bf16.mxu0 %vm1480_vm0, %v1479_v0 }
 0x5e4   :  { %1184 = vmatprep.subr.bf16.mxu0 %v1479_v0 }
 0x5e7   :  { %1185 = vmatpush3.bf16.msra.mxu0 %v1631_v5 }
 0x5e8   :  { %1198 = vmatprep.subr.bf16.mxu0 %v1479_v0 }
 0x6b5   :  { %v434_v61 = vpop.f32.mrb[8].mxu0 }
 0x6b6   :  { %v440_v62 = vadd.f32 %v434_v61, %v201_v60  ;;  %v1172_v63 = vpop.f32.mrb[9].mxu0 }
 0x6b7   :  { %v437_v1 = vpop.f32.mrb[10].mxu0 }
 0x6b8   :  { %1276 = vtanh.f32 %v440_v62  ;;  %v1173_v3 = vpop.f32.mrb[11].mxu0  ;;  %v1081_v6 = vmul.f32 -1.442695, %v440_v62 }
 0x6ba   :  { %1278 = vpow2.f32 %v1081_v6 }
 0x6c2   :  { %v1277_v4 = vpop.eup %1276 }
 0x6c3   :  { %450 = vrot.lane.b32.xlu0 %v1277_v4, %s1482_s27  ;;  %v212_v4 = vadd.f32 %v1650_v7, %v1683_v58 }
 0x6c4   :  { %v1279_v9 = vpop.eup %1278 }
 0x6c5   :  { %v444_v10 = vadd.f32 1.0, %v1279_v9 }
 0x6c7   :  { %1280 = vrcp.f32 %v444_v10 }
 0x6d1   :  { %v1281_v12 = vpop.eup %1280 }
 0x6d2   :  { %v448_v8 = vmul.f32 %v1281_v12, %v384_v48 }
 0x735   :  { %v451_v13 = vpop.permute.xlu0 %450 }
 0x736   :  { %v453_v14 = vmul.f32 %v1281_v12, %v451_v13 }
 0x738   :  { %455 = vrot.lane.b32.xlu1 %v453_v14, %s1482_s27 }
 0x7aa   :  { %v456_v15 = vpop.permute.xlu1 %455 }
 0x7ab   :  { %v458_v16 = vadd.f32 %v456_v15, %v448_v8 }
 0x7ad   :  { %1282 = vtanh.f32 %v458_v16 }
 0x7b7   :  { %v1283_v17 = vpop.eup %1282 }
 0x7b8   :  { %461 = vrot.lane.b32.xlu0 %v1283_v17, %s1482_s27 }
 0x82a   :  { %v462_v18 = vpop.permute.xlu0 %461 }
 0x82b   :  { %v464_v19 = vmul.f32 %v1281_v12, %v462_v18 }
 0x82d   :  { %v467_v20 = vpack.c.bf16 %v464_v19, %v464_v19 }
 0x82f   :  { %469 = vrot.lane.b32.xlu1 %v467_v20, %s1474_s21 }
 0x8a1   :  { %v470_v21 = vpop.permute.xlu1 %469 }
 0x8a2   :  { %1179 = vmatmul.mubr.msk.bf16.vlgmr.msra.gmra.mrb[8].mxu1 %vm248_vm2, %v470_v21 }
 0x8a3   :  { %1191 = vmatpush3.bf16.msra.mxu1 %v1626_v2  ;;  %1194 = vmatprep.mubr.msk.bf16.mxu1 %vm1480_vm0, %v1479_v0 }
 0x8a4   :  { %1192 = vmatprep.subr.bf16.mxu1 %v1479_v0 }
 0x8a7   :  { %1193 = vmatpush3.bf16.msra.mxu1 %v1631_v5 }
 0x8a8   :  { %1206 = vmatprep.subr.bf16.mxu1 %v1479_v0 }
 0x975   :  { %v508_v23 = vpop.f32.mrb[8].mxu1 }
 0x976   :  { %v514_v24 = vadd.f32 %v508_v23, %v204_v22  ;;  %v1180_v25 = vpop.f32.mrb[9].mxu1 }
 0x977   :  { %v511_v26 = vpop.f32.mrb[10].mxu1  ;;  %v217_v25 = vadd.f32 %v1677_v55, %v1650_v7 }
 0x978   :  { %1284 = vtanh.f32 %v514_v24  ;;  %v1181_v27 = vpop.f32.mrb[11].mxu1  ;;  %v1083_v29 = vmul.f32 -1.442695, %v514_v24 }
 0x97a   :  { %1286 = vpow2.f32 %v1083_v29 }
 0x982   :  { %v1285_v28 = vpop.eup %1284 }
 0x983   :  { %524 = vrot.lane.b32.xlu0 %v1285_v28, %s1482_s27 }
 0x984   :  { %v1287_v30 = vpop.eup %1286 }
 0x985   :  { %v518_v31 = vadd.f32 1.0, %v1287_v30 }
 0x987   :  { %1288 = vrcp.f32 %v518_v31 }
 0x991   :  { %v1289_v32 = vpop.eup %1288 }
 0x992   :  { %v522_v11 = vmul.f32 %v1289_v32, %v458_v16 }
 0x9f5   :  { %v525_v33 = vpop.permute.xlu0 %524 }
 0x9f6   :  { %v527_v34 = vmul.f32 %v1289_v32, %v525_v33 }
 0x9f8   :  { %529 = vrot.lane.b32.xlu1 %v527_v34, %s1482_s27 }
 0xa6a   :  { %v530_v35 = vpop.permute.xlu1 %529 }
 0xa6b   :  { %v532_v36 = vadd.f32 %v530_v35, %v522_v11 }
 0xa6d   :  { %1290 = vtanh.f32 %v532_v36 }
 0xa77   :  { %v1291_v37 = vpop.eup %1290 }
 0xa78   :  { %535 = vrot.lane.b32.xlu0 %v1291_v37, %s1482_s27 }
 0xaea   :  { %v536_v38 = vpop.permute.xlu0 %535 }
 0xaeb   :  { %v538_v39 = vmul.f32 %v1289_v32, %v536_v38 }
 0xaed   :  { %v541_v40 = vpack.c.bf16 %v538_v39, %v538_v39 }
 0xaef   :  { %543 = vrot.lane.b32.xlu1 %v541_v40, %s1474_s21  ;;  %v1255_v40 = vld [vmem:[#allocation9] sm:$0xff]  }
 0xb61   :  { %v544_v41 = vpop.permute.xlu1 %543 }
 0xb62   :  { %1187 = vmatmul.mubr.msk.bf16.vlgmr.msra.gmra.mrb[12].mxu0 %vm248_vm2, %v544_v41  ;;  %v836_v41 = vld [vmem:[#allocation3 + $0x1c] sm:$0xf] }
 0xb63   :  { %1199 = vmatpush3.bf16.msra.mxu0 %v1626_v2  ;;  %1202 = vmatprep.mubr.msk.bf16.mxu0 %vm1480_vm0, %v1479_v0 }
 0xb64   :  { %1200 = vmatprep.subr.bf16.mxu0 %v1479_v0 }
 0xb67   :  { %1201 = vmatpush3.bf16.msra.mxu0 %v1631_v5 }
 0xb68   :  { %1214 = vmatprep.subr.bf16.mxu0 %v1479_v0 }
 0xc35   :  { %v582_v43 = vpop.f32.mrb[12].mxu0 }
 0xc36   :  { %v588_v44 = vadd.f32 %v582_v43, %v209_v42  ;;  %v1188_v45 = vpop.f32.mrb[13].mxu0 }
 0xc37   :  { %v585_v46 = vpop.f32.mrb[14].mxu0 }
 0xc38   :  { %1292 = vtanh.f32 %v588_v44  ;;  %v1189_v47 = vpop.f32.mrb[15].mxu0  ;;  %v1085_v49 = vmul.f32 -1.442695, %v588_v44 }
 0xc3a   :  { %1294 = vpow2.f32 %v1085_v49 }
 0xc42   :  { %v1293_v48 = vpop.eup %1292 }
 0xc43   :  { %598 = vrot.lane.b32.xlu0 %v1293_v48, %s1482_s27 }
 0xc44   :  { %v1295_v50 = vpop.eup %1294 }
 0xc45   :  { %v592_v51 = vadd.f32 1.0, %v1295_v50  ;;  %v1092_v50 = vld [vmem:[%s1795_s5] ss:$0 sm:$0xff] }
 0xc47   :  { %1296 = vrcp.f32 %v592_v51  ;;  %v220_v51 = vadd.f32 %v1681_v57, %v1650_v7 }
 0xc51   :  { %v1297_v52 = vpop.eup %1296 }
 0xc52   :  { %v596_v56 = vmul.f32 %v1297_v52, %v532_v36 }
 0xcb5   :  { %v599_v53 = vpop.permute.xlu0 %598 }
 0xcb6   :  { %v601_v54 = vmul.f32 %v1297_v52, %v599_v53 }
 0xcb8   :  { %603 = vrot.lane.b32.xlu1 %v601_v54, %s1482_s27 }
 0xd2a   :  { %v604_v59 = vpop.permute.xlu1 %603 }
 0xd2b   :  { %v606_v60 = vadd.f32 %v604_v59, %v596_v56 }
 0xd2d   :  { %1298 = vtanh.f32 %v606_v60 }
 0xd37   :  { %v1299_v61 = vpop.eup %1298 }
 0xd38   :  { %609 = vrot.lane.b32.xlu0 %v1299_v61, %s1482_s27 }
 0xdaa   :  { %v610_v62 = vpop.permute.xlu0 %609 }
 0xdab   :  { %v612_v63 = vmul.f32 %v1297_v52, %v610_v62 }
 0xdad   :  { %v615_v1 = vpack.c.bf16 %v612_v63, %v612_v63 }
 0xdaf   :  { %617 = vrot.lane.b32.xlu1 %v615_v1, %s1474_s21 }
 0xe21   :  { %v618_v3 = vpop.permute.xlu1 %617 }
 0xe22   :  { %1195 = vmatmul.mubr.msk.bf16.vlgmr.msra.gmra.mrb[12].mxu1 %vm248_vm2, %v618_v3 }
 0xe23   :  { %1207 = vmatpush3.bf16.msra.mxu1 %v1626_v2  ;;  %1210 = vmatprep.mubr.msk.bf16.mxu1 %vm1480_vm0, %v1479_v0 }
 0xe24   :  { %1208 = vmatprep.subr.bf16.mxu1 %v1479_v0 }
 0xe27   :  { %1209 = vmatpush3.bf16.msra.mxu1 %v1631_v5 }
 0xe28   :  { %1220 = vmatprep.subr.bf16.mxu1 %v1479_v0 }
 0xef5   :  { %v656_v6 = vpop.f32.mrb[12].mxu1 }
 0xef6   :  { %v662_v9 = vadd.f32 %v656_v6, %v212_v4  ;;  %v1196_v10 = vpop.f32.mrb[13].mxu1 }
 0xef7   :  { %v659_v12 = vpop.f32.mrb[14].mxu1 }
 0xef8   :  { %1300 = vtanh.f32 %v662_v9  ;;  %v1197_v13 = vpop.f32.mrb[15].mxu1  ;;  %v1087_v2 = vmul.f32 -1.442695, %v662_v9 }
 0xefa   :  { %1302 = vpow2.f32 %v1087_v2  ;;  %v1256_v2 = vld [vmem:[#allocation11] sm:$0xff]  }
 0xf02   :  { %v1301_v14 = vpop.eup %1300 }
 0xf03   :  { %672 = vrot.lane.b32.xlu0 %v1301_v14, %s1482_s27 }
 0xf04   :  { %v1303_v8 = vpop.eup %1302 }
 0xf05   :  { %v666_v15 = vadd.f32 1.0, %v1303_v8 }
 0xf07   :  { %1304 = vrcp.f32 %v666_v15 }
 0xf11   :  { %v1305_v5 = vpop.eup %1304 }
 0xf12   :  { %v670_v58 = vmul.f32 %v1305_v5, %v606_v60 }
 0xf75   :  { %v673_v16 = vpop.permute.xlu0 %672 }
 0xf76   :  { %v675_v17 = vmul.f32 %v1305_v5, %v673_v16 }
 0xf78   :  { %677 = vrot.lane.b32.xlu1 %v675_v17, %s1482_s27  ;;  %v1257_v17 = vld [vmem:[#allocation11 + $0x8] sm:$0xff]  }
 0xfea   :  { %v678_v18 = vpop.permute.xlu1 %677 }
 0xfeb   :  { %v680_v19 = vadd.f32 %v678_v18, %v670_v58  ;;  %v1258_v58 = vld [vmem:[%s1796_s6] sm:$0xff]   ;;  %v1259_v18 = vld [vmem:[%s1796_s6 + $0x8] sm:$0xff]  }
 0xfed   :  { %1306 = vtanh.f32 %v680_v19 }
 0xff7   :  { %v1307_v20 = vpop.eup %1306 }
 0xff8   :  { %683 = vrot.lane.b32.xlu0 %v1307_v20, %s1482_s27 }
0x106a   :  { %v684_v21 = vpop.permute.xlu0 %683 }
0x106b   :  { %v686_v22 = vmul.f32 %v1305_v5, %v684_v21 }
0x106d   :  { %v689_v23 = vpack.c.bf16 %v686_v22, %v686_v22 }
0x106f   :  { %691 = vrot.lane.b32.xlu1 %v689_v23, %s1474_s21 }
0x10e1   :  { %v692_v24 = vpop.permute.xlu1 %691 }
0x10e2   :  { %1203 = vmatmul.mubr.msk.bf16.vlgmr.msra.gmra.mrb[16].mxu0 %vm248_vm2, %v692_v24 }
0x10e3   :  { %1216 = vmatprep.mubr.msk.bf16.mxu0 %vm1480_vm0, %v1479_v0  ;;  %1215 = vmatpush3.bf16.msra.mxu0 %v1255_v40 }
0x10e4   :  { %1228 = vmatprep.subr.bf16.mxu0 %v1479_v0 }
0x10ea   :  { %1217 = vmatmul.mubr.msk.bf16.vlgmr.msra.gmra.mrb[20].mxu0 %vm145_vm1, %v836_v41 }
0x10eb   :  { %1232 = vmatprep.mubr.msk.bf16.mxu0 %vm1480_vm0, %v1479_v0  ;;  %1229 = vmatpush3.bf16.msra.mxu0 %v1258_v58 }
0x10ec   :  { %1230 = vmatprep.subr.bf16.mxu0 %v1479_v0 }
0x10ef   :  { %1231 = vmatpush3.bf16.msra.mxu0 %v1259_v18 }
0x11b5   :  { %v730_v26 = vpop.f32.mrb[16].mxu0 }
0x11b6   :  { %v736_v27 = vadd.f32 %v730_v26, %v217_v25  ;;  %v1204_v28 = vpop.f32.mrb[17].mxu0 }
0x11b7   :  { %v733_v29 = vpop.f32.mrb[18].mxu0 }
0x11b8   :  { %1308 = vtanh.f32 %v736_v27  ;;  %v1205_v30 = vpop.f32.mrb[19].mxu0  ;;  %v1089_v32 = vmul.f32 -1.442695, %v736_v27 }
0x11ba   :  { %1310 = vpow2.f32 %v1089_v32  ;;  %v1102_v32 = vld [vmem:[%s1798_s8] ss:$0 sm:$0xff] }
0x11bd   :  { %v889_v46 = vpop.f32.mrb[20].mxu0 }
0x11be   :  { %v1218_v47 = vpop.f32.mrb[21].mxu0  ;;  %v890_v56 = vadd.f32 %v1092_v50, %v889_v46 }
0x11bf   :  { %v892_v48 = vpop.f32.mrb[22].mxu0 }
0x11c0   :  { %v1219_v49 = vpop.f32.mrb[23].mxu0  ;;  %v1095_v1 = vmul.f32 -1.442695, %v890_v56 }
0x11c2   :  { %v1309_v31 = vpop.eup %1308 }
0x11c3   :  { %746 = vrot.lane.b32.xlu0 %v1309_v31, %s1482_s27 }
0x11c4   :  { %v1311_v33 = vpop.eup %1310 }
0x11c5   :  { %v740_v34 = vadd.f32 1.0, %v1311_v33 }
0x11c7   :  { %1312 = vrcp.f32 %v740_v34 }
0x11d1   :  { %v1313_v11 = vpop.eup %1312 }
0x11d2   :  { %v744_v55 = vmul.f32 %v1313_v11, %v680_v19 }
0x1235   :  { %v747_v35 = vpop.permute.xlu0 %746 }
0x1236   :  { %v749_v36 = vmul.f32 %v1313_v11, %v747_v35 }
0x1238   :  { %751 = vrot.lane.b32.xlu1 %v749_v36, %s1482_s27 }
0x12aa   :  { %v752_v37 = vpop.permute.xlu1 %751 }
0x12ab   :  { %v754_v38 = vadd.f32 %v752_v37, %v744_v55 }
0x12ad   :  { %1314 = vtanh.f32 %v754_v38 }
0x12b7   :  { %v1315_v39 = vpop.eup %1314 }
0x12b8   :  { %757 = vrot.lane.b32.xlu0 %v1315_v39, %s1482_s27 }
0x132a   :  { %v758_v42 = vpop.permute.xlu0 %757 }
0x132b   :  { %v760_v43 = vmul.f32 %v1313_v11, %v758_v42 }
0x132d   :  { %v763_v44 = vpack.c.bf16 %v760_v43, %v760_v43 }
0x132f   :  { %765 = vrot.lane.b32.xlu1 %v763_v44, %s1474_s21 }
0x13a1   :  { %v766_v45 = vpop.permute.xlu1 %765 }
0x13a2   :  { %1211 = vmatmul.mubr.msk.bf16.vlgmr.msra.gmra.mrb[16].mxu1 %vm248_vm2, %v766_v45 }
0x13a3   :  { %1224 = vmatprep.mubr.msk.bf16.mxu1 %vm1480_vm0, %v1479_v0  ;;  %1221 = vmatpush3.bf16.msra.mxu1 %v1256_v2 }
0x13a4   :  { %1222 = vmatprep.subr.bf16.mxu1 %v1479_v0 }
0x13a7   :  { %1223 = vmatpush3.bf16.msra.mxu1 %v1257_v17 }
0x1475   :  { %v804_v52 = vpop.f32.mrb[16].mxu1 }
0x1476   :  { %v810_v53 = vadd.f32 %v804_v52, %v220_v51  ;;  %v1212_v54 = vpop.f32.mrb[17].mxu1 }
0x1477   :  { %v807_v59 = vpop.f32.mrb[18].mxu1 }
0x1478   :  { %1316 = vtanh.f32 %v810_v53  ;;  %v1213_v60 = vpop.f32.mrb[19].mxu1  ;;  %v1091_v63 = vmul.f32 -1.442695, %v810_v53 }
0x1479   :  { %1318 = vtanh.f32 %v890_v56 }
0x147a   :  { %1320 = vpow2.f32 %v1091_v63 }
0x147b   :  { %1322 = vpow2.f32 %v1095_v1 }
0x1482   :  { %v1317_v61 = vpop.eup %1316 }
0x1483   :  { %820 = vrot.lane.b32.xlu0 %v1317_v61, %s1482_s27  ;;  %v1319_v62 = vpop.eup %1318 }
0x1484   :  { %v1321_v3 = vpop.eup %1320 }
0x1485   :  { %v1323_v7 = vpop.eup %1322  ;;  %v814_v57 = vadd.f32 1.0, %v1321_v3 }
0x1486   :  { %v898_v4 = vadd.f32 1.0, %v1323_v7 }
0x1487   :  { %903 = vrot.lane.b32.xlu0 %v1319_v62, %s1482_s27  ;;  %1324 = vrcp.f32 %v814_v57 }
0x1488   :  { %1326 = vrcp.f32 %v898_v4 }
0x1491   :  { %v1325_v6 = vpop.eup %1324 }
0x1492   :  { %v1327_v12 = vpop.eup %1326  ;;  %v818_v15 = vmul.f32 %v1325_v6, %v754_v38 }
0x14f5   :  { %v821_v9 = vpop.permute.xlu0 %820 }
0x14f6   :  { %v823_v10 = vmul.f32 %v1325_v6, %v821_v9 }
0x14f8   :  { %825 = vrot.lane.b32.xlu1 %v823_v10, %s1482_s27 }
0x14f9   :  { %v904_v13 = vpop.permute.xlu0 %903 }
0x14fa   :  { %v906_v14 = vmul.f32 %v1327_v12, %v904_v13 }
0x14fc   :  { %1328 = vtanh.f32 %v906_v14 }
0x1506   :  { %v1329_v8 = vpop.eup %1328 }
0x1507   :  { %909 = vrot.lane.b32.xlu0 %v1329_v8, %s1474_s21 }
0x156a   :  { %v826_v5 = vpop.permute.xlu1 %825 }
0x156b   :  { %v828_v16 = vadd.f32 %v826_v5, %v818_v15 }
0x156d   :  { %1330 = vtanh.f32 %v828_v16 }
0x1577   :  { %v1331_v19 = vpop.eup %1330 }
0x1578   :  { %831 = vrot.lane.b32.xlu1 %v1331_v19, %s1482_s27 }
0x1579   :  { %v910_v20 = vpop.permute.xlu0 %909 }
0x157a   :  { %v912_v21 = vmul.f32 %v1327_v12, %v910_v20 }
0x157c   :  { %v918_v22 = vpack.c.bf16 %v912_v21, %v912_v21 }
0x157e   :  { %924 = vrot.lane.b32.xlu1 %v918_v22, %s1474_s21 }
0x15ea   :  { %v832_v23 = vpop.permute.xlu1 %831 }
0x15eb   :  { %v834_v24 = vmul.f32 %v1325_v6, %v832_v23 }
0x15ed   :  { %v913_v25 = vpack.c.bf16 %v834_v24, %v834_v24 }
0x15ef   :  { %982 = vrot.lane.b32.xlu0 %v913_v25, %s1474_s21  ;;  %s1442_s21 = scalar_lea.vmem %s1055_s10, 128 }
0x15f0   :  { %v925_v26 = vpop.permute.xlu1 %924  ;;  %p1443_p12 = scmp.ne.s32.totalorder %s1055_s10, %s1442_s21  ;;  %p1448_p0 = scmp.lt.s32.totalorder %s1442_s21, %s1442_s21 }
0x15f1   :  { %1225 = vmatmul.mubr.msk.bf16.vlgmr.msra.gmra.mrb[20].mxu1 %vm248_vm2, %v925_v26 }
0x15f2   :  { %p1449_p1 = por %p1448_p0, %p1447_p13 }
0x15f4   :  { %p1450_p2 = pnand %p1449_p1, %p1443_p12 }
0x1661   :  { %v983_v27 = vpop.permute.xlu0 %982 }
0x1662   :  { %1233 = vmatmul.mubr.msk.bf16.vlgmr.msra.gmra.mrb[24].mxu0 %vm248_vm2, %v983_v27 }
0x16c4   :  { %v975_v0 = vpop.f32.mrb[20].mxu1 }
0x16c5   :  { %v1226_v28 = vpop.f32.mrb[21].mxu1 }
0x16c6   :  { %v978_v29 = vpop.f32.mrb[22].mxu1 }
0x16c7   :  { %v1227_v30 = vpop.f32.mrb[23].mxu1 }
0x1735   :  { %v1033_v31 = vpop.f32.mrb[24].mxu0 }
0x1736   :  { %v1034_v33 = vadd.f32 %v1033_v31, %v975_v0  ;;  %v1234_v34 = vpop.f32.mrb[25].mxu0 }
0x1737   :  { %v1036_v11 = vpop.f32.mrb[26].mxu0 }
0x1738   :  { %v1046_v35 = vadd.f32 %v1102_v32, %v1034_v33  ;;  %v1235_v36 = vpop.f32.mrb[27].mxu0 }
0x173a   :  { %1047 = vst [vmem:[#allocation12] sm:$0xff] %v1046_v35 }
0x173b   :  { %1453 = shalt.err (!%p1450_p2)
}
0x173c   :  { %s1454_s8 = scalar_lea.hbm %s1799_s9, 128 }
0x173d   :  { %p1455_p3 = scmp.ne.s32.totalorder %s1799_s9, %s1454_s8  ;;  %p1458_p4 = scmp.lt.u32.totalorder %s1454_s8, %s1799_s9 }
0x173f   :  { %p1460_p5 = pnand %p1458_p4, %p1455_p3 }
0x1741   :  { %1463 = shalt.err (!%p1460_p5)
}
0x1742   :  { %1057 = dma.vmem_to_hbm [thread:$0]  %s1055_s10, 128, %s1799_s9, [#allocation5]  }
0x1743   :  { %1470 = dma.done.wait [#allocation5], 128  }
0x1744   :  { %1471 = vsyncadd [#allocation5], 4294967168 }
0x1745   :  { %1061 = vsyncpa [#allocation4], 1 }
0x1746   :  { %1062 = vsyncpa [#allocation7], 1 }
0x1747   :  { %1063 = vsyncpa [#allocation10], 1 }
0x1748   :  { %1064 = vsyncpa [#allocation5], 1 }

</bundles_post_ra>
